<compile_context>
chip_gen: v6e
topology: v6e:2x2x1
jax: 0.10.0
libtpu: 0.0.40
codegen_flags: <defaults>
</compile_context>

<pallas_src>
import functools

import jax
import jax.numpy as jnp
from jax import lax
from jax.experimental import pallas as pl
from jax.experimental.pallas import tpu as pltpu


# --------------------------------------------------------------------------- kernel


def _mlm_share_kernel(x_ref, cb_ref, o_ref, m_scr, l_scr, *, tv, nv, v_true, v_pad):
    """One grid step = (domain d, batch-tile b, codebook-tile v).

    x_ref  : [Tb, H]      batch tile of the BERT output for domain d (D squeezed)
    cb_ref : [H, Tv]      codebook tile, pre-transposed (contraction on sublanes)
    o_ref  : [Tb, Vpad]   VMEM-resident output block for (d, b) (revisited over v)
    m_scr  : [Tb, 1] f32  running row max
    l_scr  : [Tb, 1] f32  running sum of exp(logit - m)
    """
    v_idx = pl.program_id(2)

    @pl.when(v_idx == 0)
    def _init():
        m_scr[...] = jnp.full_like(m_scr, -jnp.inf)
        l_scr[...] = jnp.zeros_like(l_scr)

    # MXU: [Tb, H] @ [H, Tv] -> [Tb, Tv]; operands in their native dtype
    # (bf16-friendly), f32 accumulation.
    logits = jnp.dot(x_ref[...], cb_ref[...], preferred_element_type=jnp.float32)

    if v_pad != v_true:
        # Padding only exists in the final V tile -> gate the mask on it so the
        # iota/compare/select does not run on every inner-grid step.
        def _mask_last_tile():
            col = v_idx * tv + lax.broadcasted_iota(jnp.int32, logits.shape, 1)
            return jnp.where(col < v_true, logits, -jnp.inf)

        logits_lse = lax.cond(v_idx == nv - 1, _mask_last_tile, lambda: logits)
    else:
        logits_lse = logits

    # Online logsumexp update.  Raw logits written below never need rescaling:
    # the final log-softmax is simply logits - (m + log l).
    m_prev = m_scr[...]
    m_new = jnp.maximum(m_prev, jnp.max(logits_lse, axis=-1, keepdims=True))
    l_new = (l_scr[...] * jnp.exp(m_prev - m_new)
             + jnp.sum(jnp.exp(logits_lse - m_new), axis=-1, keepdims=True))
    m_scr[...] = m_new
    l_scr[...] = l_new

    if nv == 1:
        # Single codebook tile per (domain, batch-tile): finalize in place.
        o_ref[...] = (logits - (m_new + jnp.log(l_new))).astype(o_ref.dtype)
    else:
        # Park this tile's raw logits directly in the resident output block
        # (lane-aligned dynamic slice; start is a multiple of tv >= 128).
        start = pl.multiple_of(v_idx * tv, tv)
        o_ref[:, pl.ds(start, tv)] = logits.astype(o_ref.dtype)

        @pl.when(v_idx == nv - 1)
        def _finalize():
            lse = m_scr[...] + jnp.log(l_scr[...])                    # [Tb, 1] f32
            o_ref[...] = (o_ref[...].astype(jnp.float32) - lse).astype(o_ref.dtype)


# --------------------------------------------------------------------------- wrapper


def _round_up(n, m):
    return ((n + m - 1) // m) * m


def _pick_batch_tile(b, cap=256):
    """Always returns a multiple of 8 (B is padded in the wrapper if needed)."""
    b8 = _round_up(b, 8)
    if b8 <= cap:
        return b8
    t = (cap // 8) * 8
    while t >= 8:
        if b8 % t == 0 and t >= 64:
            return t
        t -= 8
    # No decent divisor: use a fixed aligned tile and pad B instead of falling
    # back to a tiny / misaligned batch tile.
    return min(cap, 128)


def prepare_code_books(code_books_vh, dtype=None):
    """[n_domains, V, H] (PyTorch layout) -> [n_domains, H, V] (+ optional cast).

    Done once at parameter-setup time so the kernel never transposes the (large)
    codebooks per step.  dtype=jnp.bfloat16 halves the dominant codebook HBM
    stream on this memory-bound kernel.
    """
    cb = jnp.swapaxes(code_books_vh, 1, 2)
    if dtype is not None:
        cb = cb.astype(dtype)
    return cb


def masked_language_model_share(x, code_books_hv, *, tb=None, tv=None,
                                out_dtype=jnp.float32):
    """
    x             : [B, n_domains, H]   (PyTorch layout)
    code_books_hv : [n_domains, H, V]   (see prepare_code_books)
    returns       : [n_domains, B, V]   stacked log-softmax logits
    """
    B, D, H = x.shape
    Dc, Hc, V = code_books_hv.shape
    assert (D, H) == (Dc, Hc), "x / code_books shape mismatch"
    out_itemsize = jnp.dtype(out_dtype).itemsize

    # ---- codebook (V) tiling: lane-aligned tiles, pad V up to a tile multiple ----
    if tv is None:
        tv = V if V <= 2048 else 512          # 512 = multiple of 256 (v6e/v7x MXU)
    if tv >= V:
        tv, v_pad = V, V                      # whole codebook in one tile
    else:
        assert tv % 128 == 0, "codebook tile must be lane-aligned when V is tiled"
        v_pad = _round_up(V, tv)
    nv = v_pad // tv

    # ---- batch (B) tiling: as large as VMEM allows (cuts codebook re-streaming) ----
    def _vmem_bytes(tb_):
        x_b = 2 * tb_ * H * x.dtype.itemsize                     # double-buffered x tile
        cb_b = 2 * H * tv * code_books_hv.dtype.itemsize          # double-buffered cb tile
        out_b = 2 * tb_ * v_pad * out_itemsize                    # resident output block
        scr_b = 2 * tb_ * 128 * 4                                 # m / l scratch (lane-padded)
        return x_b + cb_b + out_b + scr_b

    if tb is None:
        tb = _pick_batch_tile(B, cap=256)
    else:
        tb = max(8, _round_up(tb, 8))
    budget = 40 * 2**20                       # safe on v5e/v6e (128 MiB) and v7x (64 MiB)
    while _vmem_bytes(tb) > budget and tb > 8:
        tb = max(8, _round_up(tb // 2, 8))
    b_pad = _round_up(B, tb)

    # Explicit VMEM limit (never below the 32 MiB default, never above 48 MiB).
    vmem_limit = int(min(max(2 * _vmem_bytes(tb) + 4 * 2**20, 32 * 2**20), 48 * 2**20))

    # ---- layout prep (small tensors relative to the codebook stream) ----
    x_dbh = jnp.transpose(x, (1, 0, 2))       # [D, B, H]: contiguous [Tb, H] tile DMAs
    if b_pad != B:
        x_dbh = jnp.pad(x_dbh, ((0, 0), (0, b_pad - B), (0, 0)))
    cb = code_books_hv
    if v_pad != V:
        cb = jnp.pad(cb, ((0, 0), (0, 0), (0, v_pad - V)))

    grid = (D, b_pad // tb, nv)
    kernel = functools.partial(_mlm_share_kernel, tv=tv, nv=nv, v_true=V, v_pad=v_pad)

    out = pl.pallas_call(
        kernel,
        out_shape=jax.ShapeDtypeStruct((D, b_pad, v_pad), out_dtype),
        grid_spec=pltpu.PrefetchScalarGridSpec(
            num_scalar_prefetch=0,
            grid=grid,
            in_specs=[
                # x in [D, B, H]; domain axis squeezed -> kernel sees [Tb, H].
                pl.BlockSpec((None, tb, H), lambda d, b, v: (d, b, 0)),
                # codebook tile [H, Tv]: contraction on sublanes, V on lanes.
                pl.BlockSpec((None, H, tv), lambda d, b, v: (d, 0, v)),
            ],
            # Output block is VMEM-resident across the V (reduction) axis.
            out_specs=pl.BlockSpec((None, tb, v_pad), lambda d, b, v: (d, b, 0)),
            scratch_shapes=[pltpu.VMEM((tb, 1), jnp.float32),     # running max
                            pltpu.VMEM((tb, 1), jnp.float32)],    # running sum-exp
        ),
        compiler_params=pltpu.CompilerParams(
            dimension_semantics=("parallel", "parallel", "arbitrary"),
            vmem_limit_bytes=vmem_limit,
        ),
        cost_estimate=pl.CostEstimate(
            flops=2 * D * b_pad * v_pad * H,
            transcendentals=D * b_pad * v_pad,
            bytes_accessed=(x_dbh.size * x_dbh.dtype.itemsize
                            + cb.size * cb.dtype.itemsize * (b_pad // tb)
                            + D * b_pad * v_pad * out_itemsize),
        ),
    )(x_dbh, cb)

    return out[:, :B, :V]


def masked_language_model_share_list(x, code_books_hv, **kwargs):
    """API parity with the PyTorch module: a list of n_domains [B, V] arrays."""
    return list(masked_language_model_share(x, code_books_hv, **kwargs))


# ------------------------------------------------------------------------- reference


def _reference(x, code_books_vh):
    """Pure-JAX reference of the PyTorch forward; returns stacked [D, B, V]."""
    outs = []
    for d in range(code_books_vh.shape[0]):
        logits = jnp.matmul(x[:, d, :], code_books_vh[d].T,
                            precision=lax.Precision.HIGHEST,
                            preferred_element_type=jnp.float32)
        outs.append(jax.nn.log_softmax(logits, axis=-1))
    return jnp.stack(outs)


# ------------------------------------------------------------------------------ main


if __name__ == "__main__":
    key = jax.random.PRNGKey(0)
    k1, k2, k3, k4 = jax.random.split(key, 4)

    # ---- case 1: module-scale small shapes (single codebook tile per domain) ----
    B, D, H, V = 8, 4, 32, 128
    x = jax.random.normal(k1, (B, D, H), dtype=jnp.float32)
    code_books = 0.02 * jax.random.normal(k2, (D, V, H), dtype=jnp.float32)
    cb_hv = prepare_code_books(code_books)            # stored once as [D, H, V]

    out = jax.block_until_ready(masked_language_model_share(x, cb_hv))
    ref = _reference(x, code_books)
    assert out.shape == (D, B, V)
    assert jnp.allclose(out, ref, atol=2e-3, rtol=2e-3)

    # List-returning wrapper (matches the PyTorch module's return type).
    outs_list = masked_language_model_share_list(x, cb_hv)
    assert len(outs_list) == D and outs_list[0].shape == (B, V)

    # ---- case 2: exercise V tiling + V padding, B padding (B=12), online lse ----
    B2, D2, H2, V2 = 12, 2, 64, 1000
    x2 = jax.random.normal(k3, (B2, D2, H2), dtype=jnp.float32)
    code_books2 = 0.05 * jax.random.normal(k4, (D2, V2, H2), dtype=jnp.float32)
    cb2_hv = prepare_code_books(code_books2)

    out2 = jax.block_until_ready(
        masked_language_model_share(x2, cb2_hv, tv=256))   # nv=4, v_pad=1024, b_pad=16
    ref2 = _reference(x2, code_books2)
    assert out2.shape == (D2, B2, V2)
    assert jnp.allclose(out2, ref2, atol=2e-3, rtol=2e-3)

    # ---- case 3: bf16 operands (the memory-bound production configuration) ----
    cb2_bf16 = prepare_code_books(code_books2, dtype=jnp.bfloat16)
    out3 = jax.block_until_ready(
        masked_language_model_share(x2.astype(jnp.bfloat16), cb2_bf16, tv=256))
    assert out3.shape == (D2, B2, V2)
    assert jnp.allclose(out3, ref2, atol=5e-2, rtol=5e-2)

    print("KERNEL_OK")
</pallas_src>

<mosaic_0001>
module attributes {stable_mosaic.version = 11 : i64} {
  func.func @_mlm_share_kernel(%arg0: i32, %arg1: i32, %arg2: i32, %arg3: memref<1x8x32xf32, #tpu.memory_space<vmem>>, %arg4: memref<1x32x128xf32, #tpu.memory_space<vmem>>, %arg5: memref<1x8x128xf32, #tpu.memory_space<vmem>>, %arg6: memref<8x1xf32, #tpu.memory_space<vmem>>, %arg7: memref<8x1xf32, #tpu.memory_space<vmem>>) attributes {dimension_semantics = [#tpu.dimension_semantics<parallel>, #tpu.dimension_semantics<parallel>, #tpu.dimension_semantics<arbitrary>], iteration_bounds = array<i64: 4, 1, 1>, scalar_prefetch = 0 : i64, scratch_operands = 2 : i64, tpu.core_type = #tpu.core_type<tc>, window_params = [{transform_indices = @transform_0, window_bounds = array<i64: 1, 8, 32>}, {transform_indices = @transform_1, window_bounds = array<i64: 1, 32, 128>}, {transform_indices = @transform_2, window_bounds = array<i64: 1, 8, 128>}]} {
    %c0_i32 = arith.constant 0 : i32
    %0 = arith.cmpi eq, %arg2, %c0_i32 : i32
    %1 = arith.extui %0 : i1 to i32
    %c0_i32_0 = arith.constant 0 : i32
    %2 = arith.cmpi ne, %1, %c0_i32_0 : i32
    scf.if %2 {
      %cst_19 = arith.constant 0xFF800000 : f32
      %31 = vector.broadcast %cst_19 : f32 to vector<8x1xf32>
      %c0_20 = arith.constant 0 : index
      %c0_21 = arith.constant 0 : index
      %32 = vector.load %arg6[%c0_20, %c0_21] : memref<8x1xf32, #tpu.memory_space<vmem>>, vector<8x1xf32>
      tpu.vector_store %arg6[%c0_20, %c0_21], %31 {strides = array<i32>} : memref<8x1xf32, #tpu.memory_space<vmem>>, vector<8x1xf32>,
      %cst_22 = arith.constant 0.000000e+00 : f32
      %33 = vector.broadcast %cst_22 : f32 to vector<8x1xf32>
      %c0_23 = arith.constant 0 : index
      %c0_24 = arith.constant 0 : index
      %34 = vector.load %arg7[%c0_23, %c0_24] : memref<8x1xf32, #tpu.memory_space<vmem>>, vector<8x1xf32>
      tpu.vector_store %arg7[%c0_23, %c0_24], %33 {strides = array<i32>} : memref<8x1xf32, #tpu.memory_space<vmem>>, vector<8x1xf32>,
    } else {
    }
    %c0 = arith.constant 0 : index
    %c0_1 = arith.constant 0 : index
    %c0_2 = arith.constant 0 : index
    %3 = vector.load %arg3[%c0, %c0_1, %c0_2] : memref<1x8x32xf32, #tpu.memory_space<vmem>>, vector<1x8x32xf32>
    %4 = vector.shape_cast %3 : vector<1x8x32xf32> to vector<8x32xf32>
    %c0_3 = arith.constant 0 : index
    %c0_4 = arith.constant 0 : index
    %c0_5 = arith.constant 0 : index
    %5 = vector.load %arg4[%c0_3, %c0_4, %c0_5] : memref<1x32x128xf32, #tpu.memory_space<vmem>>, vector<1x32x128xf32>
    %6 = vector.shape_cast %5 : vector<1x32x128xf32> to vector<32x128xf32>
    %cst = arith.constant dense<0.000000e+00> : vector<8x128xf32>
    %7 = tpu.matmul %4, %6, %cst {dimension_numbers = #tpu.dot_dimension_numbers<[1], [0], [0], [1], [0, 0, 1, 1], [], []>} : vector<8x32xf32>, vector<32x128xf32>, vector<8x128xf32> -> vector<8x128xf32>
    %c0_6 = arith.constant 0 : index
    %c0_7 = arith.constant 0 : index
    %8 = vector.load %arg6[%c0_6, %c0_7] : memref<8x1xf32, #tpu.memory_space<vmem>>, vector<8x1xf32>
    %cst_8 = arith.constant dense<0xFF800000> : vector<8xf32>
    %9 = vector.multi_reduction <maximumf>, %7, %cst_8 [1] : vector<8x128xf32> to vector<8xf32>
    %10 = vector.shape_cast %9 : vector<8xf32> to vector<8x1xf32>
    %11 = arith.maximumf %8, %10 : vector<8x1xf32>
    %c0_9 = arith.constant 0 : index
    %c0_10 = arith.constant 0 : index
    %12 = vector.load %arg7[%c0_9, %c0_10] : memref<8x1xf32, #tpu.memory_space<vmem>>, vector<8x1xf32>
    %13 = arith.subf %8, %11 : vector<8x1xf32>
    %14 = math.exp %13 : vector<8x1xf32>
    %15 = arith.mulf %12, %14 : vector<8x1xf32>
    %16 = vector.broadcast %11 : vector<8x1xf32> to vector<8x128xf32>
    %17 = arith.subf %7, %16 : vector<8x128xf32>
    %18 = math.exp %17 : vector<8x128xf32>
    %cst_11 = arith.constant dense<0.000000e+00> : vector<8xf32>
    %19 = vector.multi_reduction <add>, %18, %cst_11 [1] : vector<8x128xf32> to vector<8xf32>
    %20 = vector.shape_cast %19 : vector<8xf32> to vector<8x1xf32>
    %21 = arith.addf %15, %20 : vector<8x1xf32>
    %c0_12 = arith.constant 0 : index
    %c0_13 = arith.constant 0 : index
    %22 = vector.load %arg6[%c0_12, %c0_13] : memref<8x1xf32, #tpu.memory_space<vmem>>, vector<8x1xf32>
    tpu.vector_store %arg6[%c0_12, %c0_13], %11 {strides = array<i32>} : memref<8x1xf32, #tpu.memory_space<vmem>>, vector<8x1xf32>,
    %c0_14 = arith.constant 0 : index
    %c0_15 = arith.constant 0 : index
    %23 = vector.load %arg7[%c0_14, %c0_15] : memref<8x1xf32, #tpu.memory_space<vmem>>, vector<8x1xf32>
    tpu.vector_store %arg7[%c0_14, %c0_15], %21 {strides = array<i32>} : memref<8x1xf32, #tpu.memory_space<vmem>>, vector<8x1xf32>,
    %24 = math.log %21 : vector<8x1xf32>
    %25 = arith.addf %11, %24 : vector<8x1xf32>
    %26 = vector.broadcast %25 : vector<8x1xf32> to vector<8x128xf32>
    %27 = arith.subf %7, %26 : vector<8x128xf32>
    %c0_16 = arith.constant 0 : index
    %c0_17 = arith.constant 0 : index
    %c0_18 = arith.constant 0 : index
    %28 = vector.load %arg5[%c0_16, %c0_17, %c0_18] : memref<1x8x128xf32, #tpu.memory_space<vmem>>, vector<1x8x128xf32>
    %29 = vector.shape_cast %28 : vector<1x8x128xf32> to vector<8x128xf32>
    %30 = vector.shape_cast %27 : vector<8x128xf32> to vector<1x8x128xf32>
    tpu.vector_store %arg5[%c0_16, %c0_17, %c0_18], %30 {strides = array<i32>} : memref<1x8x128xf32, #tpu.memory_space<vmem>>, vector<1x8x128xf32>,
    return
  }
  func.func @transform_0(%arg0: i32, %arg1: i32, %arg2: i32) -> (i32, i32, i32) {
    %c0_i32 = arith.constant 0 : i32
    %c0_i32_0 = arith.constant 0 : i32
    return %arg0, %arg1, %c0_i32 : i32, i32, i32
  }
  func.func @transform_1(%arg0: i32, %arg1: i32, %arg2: i32) -> (i32, i32, i32) {
    %c0_i32 = arith.constant 0 : i32
    %c0_i32_0 = arith.constant 0 : i32
    return %arg0, %c0_i32, %arg2 : i32, i32, i32
  }
  func.func @transform_2(%arg0: i32, %arg1: i32, %arg2: i32) -> (i32, i32, i32) {
    %c0_i32 = arith.constant 0 : i32
    %c0_i32_0 = arith.constant 0 : i32
    return %arg0, %arg1, %c0_i32 : i32, i32, i32
  }
}

</mosaic_0001>

<bundles_post_ra>
// kernel: tpu_custom_call.1
= control target key start
LH: loop header
LB: loop body
LE: loop exit
PB: predicated region body
PF: predicated region fallthrough
CT: control target
= control target key end

     0   :  { %7 = vsyncpa [#allocation5], 0  ;;  %s920_s0 = inlined_call_operand.hbm [shape: f32[4,8,32], index: 0, kind: input, shape index: {}]   ;;  %s921_s1 = inlined_call_operand.hbm [shape: f32[4,32,128], index: 1, kind: input, shape index: {}]   ;;  %s922_s2 = inlined_call_operand.hbm [shape: f32[4,8,128], index: 2, kind: output, shape index: {}]  }
   0x1   :  { %9 = vsyncpa [#allocation5 + $0x1], 0 }
   0x2   :  { %10 = vsyncpa [#allocation8], 0 }
   0x3   :  { %12 = vsyncpa [#allocation8 + $0x1], 0 }
   0x4   :  { %13 = vsyncpa [#allocation6], 0 }
   0x5   :  { %15 = vsyncpa [#allocation6 + $0x1], 0  ;;  %s750_s9 = smov 0   ;;  %s752_s10 = smov 0  }
   0x6   :  { %s754_s11 = smov 0   ;;  %s756_s12 = smov 0  }
   0x7   :  { %s758_s13 = smov 0   ;;  %s760_s14 = smov 0  }
   0x8 LB: > { %s468_s15 = sadd.s32 4294967295, %s724_s14   ;;  %s469_s16 = sadd.s32 4294967294, %s724_s14   ;;  %s724_s14 = sphi %s760_s14, %s21_s14   ;;  %s720_s13 = sphi %s758_s13, %s933_s13   ;;  %s716_s12 = sphi %s756_s12, %s932_s12   ;;  %s712_s11 = sphi %s754_s11, %s931_s11   ;;  %s708_s10 = sphi %s752_s10, %s930_s10   ;;  %s704_s9 = sphi %s750_s9, %s929_s9  }
   0x9   : > { %s40_s17 = sadd.s32 1, %s720_s13  ;;  %s49_s18 = sadd.s32 1, %s712_s11 }
   0xa   : > { %p42_p0 = scmp.ge.s32.totalorder %s40_s17, 4  ;;  %p56_p1 = scmp.ne.s32.totalorder %s712_s11, %s708_s10 }
   0xb   : > { %p57_p2 = scmp.eq.s32.totalorder %s724_s14, 0  ;;  %p62_p3 = scmp.ne.s32.totalorder %s708_s10, %s704_s9 }
   0xc   : > { %s935_s17 = smov (%p42_p0, %s40_s17), 0  ;;  %p63_p5 = scmp.eq.s32.totalorder %s468_s15, 0 }
   0xd   : > { %p791_p4 = por %p57_p2, %p56_p1  ;;  %s44_s20 = ssub.s32 %s720_s13, %s935_s17 }
   0xe   : > { %p116_p6 = scmp.eq.s32.totalorder %s468_s15, 3  ;;  %p47_p7 = scmp.eq.s32.totalorder %s44_s20, 0 }
   0xf   : > { %p797_p8 = por %p63_p5, %p62_p3  ;;  %p122_p10 = scmp.eq.s32.totalorder %s469_s16, 3 }
  0x10   : > { %p801_p9 = por %p116_p6, %p56_p1  ;;  %p520_p12 = scmp.lt.s32.totalorder %s724_s14, 4 }
  0x11   : > { %s806_s23 = scalar_select %p47_p7, %s712_s11, %s49_s18  }
  0x12   : > { %p808_p11 = por %p122_p10, %p62_p3  ;;  %s814_s25 = sand.u32 1, %s712_s11  }
  0x13   : > { %s472_s26 = sshll.u32 %s814_s25, 3  ;;  %s473_s27 = sshll.u32 %s720_s13, 7 }
  0x14   : > { %s152_s30 = scalar_lea.hbm %s920_s0, %s473_s27  ;;  %s146_s3 = scalar_lea.vmem [#allocation4], %s472_s26 }
  0x15   : > { %s154_s4 = sshll.u32 %s146_s3, 4  ;;  %p823_p13 = pnand %p520_p12, %p791_p4  ;;  %s155_s4 = int_to_ptr.vmem [resolvable:$true] %s154_s4 }
  0x16   : > { %p477_p0 = scmp.ge.s32.totalorder %s724_s14, 1  ;;  %p181_p1 = scmp.lt.s32.totalorder %s724_s14, 5 }
  0x17   : > { %s143_s6 = scalar_lea.sflag [#allocation5], %s814_s25  ;;  %p586_p2 = pneg %p823_p13 }
  0x18   : > { %s597_s7 = scalar_lea.vmem %s155_s4, 128  ;;  %s726_s8 = smov [#allocation4]  }
  0x19   : > { %p598_p3 = scmp.ne.s32.totalorder %s155_s4, %s597_s7  ;;  %s602_s15 = sshll.u32 %s726_s8, 4  ;;  %s603_s15 = int_to_ptr.vmem [resolvable:$false] %s602_s15 }
  0x1a   : > { %s604_s16 = scalar_lea.vmem %s603_s15, 256  ;;  %p605_p4 = scmp.lt.s32.totalorder %s155_s4, %s603_s15 }
  0x1b   : > { %p600_p5 = pnand %p598_p3, %p586_p2  ;;  %p606_p7 = scmp.lt.s32.totalorder %s604_s16, %s597_s7 }
  0x1d   : > { %p601_p6 = pneg %p600_p5  ;;  %p607_p10 = por %p606_p7, %p605_p4 }
  0x1f   : > { %p608_p12 = pnand %p607_p10, %p601_p6 }
  0x21   : > { %611 = shalt.err (!%p608_p12)
}
  0x22   : > { %512 = dma.hbm_to_vmem [thread:$0]  (!%p823_p13), %s152_s30, 128, %s155_s4, %s143_s6  }
  0x23   : > { %p841_p3 = pnand %p477_p0, %p181_p1  ;;  %s474_s19 = sshll.u32 %s814_s25, 5 }
  0x24   : > { %s486_s20 = sshll.u32 %s720_s13, 9  ;;  %s165_s29 = scalar_lea.vmem [#allocation7], %s474_s19 }
  0x25   : > { %s172_s28 = scalar_lea.hbm %s921_s1, %s486_s20  ;;  %s173_s3 = sshll.u32 %s165_s29, 4  ;;  %s174_s3 = int_to_ptr.vmem [resolvable:$true] %s173_s3 }
  0x26   : > { %s162_s7 = scalar_lea.sflag [#allocation8], %s814_s25  ;;  %s625_s8 = scalar_lea.vmem %s174_s3, 512 }
  0x27   : > { %p626_p5 = scmp.ne.s32.totalorder %s174_s3, %s625_s8  ;;  %s727_s30 = smov [#allocation7]  }
  0x28   : > { %s630_s4 = sshll.u32 %s727_s30, 4  ;;  %s631_s4 = int_to_ptr.vmem [resolvable:$false] %s630_s4 }
  0x29   : > { %p628_p6 = pnand %p626_p5, %p586_p2  ;;  %s632_s6 = scalar_lea.vmem %s631_s4, 1024 }
  0x2a   : > { %p633_p0 = scmp.lt.s32.totalorder %s174_s3, %s631_s4  ;;  %p634_p1 = scmp.lt.s32.totalorder %s632_s6, %s625_s8 }
  0x2b   : > { %p629_p4 = pneg %p628_p6 }
  0x2c   : > { %p635_p7 = por %p634_p1, %p633_p0 }
  0x2e   : > { %p636_p10 = pnand %p635_p7, %p629_p4 }
  0x30   : > { %639 = shalt.err (!%p636_p10)
}
  0x31   : > { %s728_s15 = smov 128   ;;  %s729_s16 = smov 8  }
  0x32   : > { %515 = dma.hbm_to_vmem [thread:$0]  (!%p823_p13), %s172_s28, 512, %s174_s3, %s162_s7, %s728_s15, %s728_s15, %s729_s16  }
  0x33   : > { %185 = sbr.rel (%p841_p3) target bundleno = 841 (0x349), region = 28  ;;  %s859_s25 = sand.u32 (!%p841_p3), 1, %s708_s10  }
  0x34   : > { %s478_s19 = sshll.u32 (!%p841_p3), %s859_s25, 3  ;;  %s188_s20 = scalar_lea.sflag (!%p841_p3), [#allocation5], %s859_s25 }
  0x35   : > { %s191_s26 = scalar_lea.vmem (!%p841_p3), [#allocation4], %s478_s19 }
  0x38   : > { %691 = dma.done.wait (%p797_p8), %s188_s20, 128  }
  0x39   : > { %693 = vsyncadd (%p797_p8), %s188_s20, 4294967168  ;;  %s479_s5 = sshll.u32 %s859_s25, 5  ;;  %s197_s18 = scalar_lea.sflag [#allocation8], %s859_s25 }
  0x3a   : > { %s200_s27 = scalar_lea.vmem [#allocation7], %s479_s5 }
  0x3b   : > { %695 = dma.done.wait (%p797_p8), %s197_s18, 512  }
  0x3c   : > { %697 = vsyncadd (%p797_p8), %s197_s18, 4294966784  ;;  %v730_v0 = vmov 0.0   ;;  %vm731_vm0 = vmmov 0   ;;  %v237_v1 = vld [vmem:[%s200_s27 + $0x18] sm:$0xff]  ;;  %v236_v2 = vld [vmem:[%s200_s27 + $0x10] sm:$0xff]  ;;  %vm238_vm1 = vcmask 261120  }
  0x3d   : > { %492 = vmatprep.subr.mxu0 %v730_v0  ;;  %500 = vmatprep.mubr.msk.f32.mxu0 %vm731_vm0, %v730_v0  ;;  %v235_v3 = vld [vmem:[%s200_s27 + $0x8] sm:$0xff]  ;;  %v234_v4 = vld [vmem:[%s200_s27] sm:$0xff]  ;;  %v233_v5 = vld [vmem:[%s191_s26] sm:$0xff]  ;;  %vm230_vm2 = vcmask 7168   ;;  %v732_v6 = vmov -inf   ;;  %v733_v9 = vmov 0  }
  0x3e   : > { %493 = vmatpush3.msra.mxu0 %v237_v1  ;;  %231 = vst.msk [vmem:[#allocation2] sm:$0xff] %vm230_vm2, %v732_v6  ;;  %232 = vst.msk [vmem:[#allocation3] sm:$0xff] %vm230_vm2, %v730_v0  ;;  %576 = vset.pattern.permute.xlu0 %v733_v9  ;;  %s483_s21 = sshll.u32 %s716_s12, 7  ;;  %s225_s28 = scalar_lea.vmem [#allocation9], %s478_s19 }
  0x3f   : > { %494 = vmatprep.subr.mxu0 %v730_v0  ;;  %577 = vset.pattern.permute.xlu1 %v733_v9  ;;  %s360_s29 = sshll.u32 %s225_s28, 4  ;;  %s358_s8 = scalar_lea.hbm %s922_s2, %s483_s21  ;;  %s361_s29 = int_to_ptr.vmem [resolvable:$true] %s360_s29 }
  0x40   : > { %495 = vmatpush3.msra.mxu0 %v236_v2  ;;  %s346_s30 = scalar_lea.sflag [#allocation6], %s859_s25  ;;  %s640_s4 = scalar_lea.vmem %s361_s29, 128 }
  0x41   : > { %496 = vmatprep.subr.mxu0 %v730_v0  ;;  %p641_p8 = scmp.ne.s32.totalorder %s361_s29, %s640_s4  ;;  %s734_s6 = smov [#allocation9]  }
  0x42   : > { %497 = vmatpush3.msra.mxu0 %v235_v3  ;;  %s644_s15 = sshll.u32 %s734_s6, 4  ;;  %s645_s15 = int_to_ptr.vmem [resolvable:$false] %s644_s15 }
  0x43   : > { %498 = vmatprep.subr.mxu0 %v730_v0  ;;  %p642_p13 = pnand %p641_p8, %p801_p9  ;;  %s646_s12 = scalar_lea.vmem %s645_s15, 256 }
  0x44   : > { %499 = vmatpush3.msra.mxu0 %v234_v4  ;;  %p647_p12 = scmp.lt.s32.totalorder %s361_s29, %s645_s15  ;;  %p648_p3 = scmp.lt.s32.totalorder %s646_s12, %s640_s4 }
  0x45   : > { %501 = vmatmul.mubr.msk.f32.vlgmr.msra.gmra.mxu0 %vm238_vm1, %v233_v5  ;;  %v312_v10 = vld [vmem:[#allocation2] sm:$0xff]  ;;  %v316_v20 = vld [vmem:[#allocation3] sm:$0xff]  ;;  %p643_p2 = pneg %p642_p13 }
  0x46   : > { %p649_p5 = por %p648_p3, %p647_p12 }
  0x48   : > { %p650_p6 = pnand %p649_p5, %p643_p2 }
 0x105   : > { %v308_v7 = vpop.f32.mrf.mxu0 }
 0x106   : > { %313 = vmax.xlane.f32.xlu0 %v308_v7 }
 0x107   : > { %v502_v8 = vpop.f32.mrf.mxu0 }
 0x18f   : > { %v314_v11 = vpop.xlane.xlu0 %313 }
 0x190   : > { %v315_v12 = vmax.f32 %v312_v10, %v314_v11 }
 0x192   : > { %333 = vst.msk [vmem:[#allocation2] sm:$0xff] %vm230_vm2, %v315_v12  ;;  %323 = vperm.xlu0 %576, %v315_v12   ;;  %v317_v17 = vsub.f32 %v312_v10, %v315_v12 }
 0x194   : > { %v318_v18 = vmul.f32 1.442695, %v317_v17 }
 0x20d   : > { %v324_v13 = vpop.permute.xlu0 %323 }
 0x20e   : > { %v326_v14 = vsub.f32 %v308_v7, %v324_v13 }
 0x210   : > { %v327_v15 = vmul.f32 1.442695, %v326_v14 }
 0x212   : > { %578 = vpow2.f32 %v327_v15 }
 0x213   : > { %580 = vpow2.f32 %v318_v18 }
 0x21f   : > { %v579_v16 = vpop.eup %578 }
 0x220   : > { %329 = vadd.xlane.f32.xlu1 %v579_v16  ;;  %v581_v19 = vpop.eup %580 }
 0x221   : > { %v320_v21 = vmul.f32 %v581_v19, %v316_v20 }
 0x2a9   : > { %v330_v22 = vpop.xlane.xlu1 %329 }
 0x2aa   : > { %v331_v23 = vadd.f32 %v330_v22, %v320_v21 }
 0x2ac   : > { %334 = vst.msk [vmem:[#allocation3] sm:$0xff] %vm230_vm2, %v331_v23  ;;  %582 = vlog2.f32 %v331_v23 }
 0x2b9   : > { %v583_v24 = vpop.eup %582 }
 0x2ba   : > { %v336_v25 = vmul.f32 0.6931472, %v583_v24 }
 0x2bc   : > { %v337_v26 = vadd.f32 %v336_v25, %v315_v12 }
 0x2be   : > { %340 = vperm.xlu1 %577, %v337_v26  }
 0x339   : > { %v341_v27 = vpop.permute.xlu1 %340 }
 0x33a   : > { %v343_v28 = vsub.f32 %v308_v7, %v341_v27 }
 0x33c   : > { %344 = vst [vmem:[%s225_s28] sm:$0xff] %v343_v28 }
 0x33d   : > { %653 = shalt.err (!%p650_p6)
}
 0x33e   : > { %s654_s16 = scalar_lea.hbm %s358_s8, 128  ;;  %s658_s20 = scalar_lea.hbm %s922_s2, 512 }
 0x33f   : > { %p655_p4 = scmp.ne.s32.totalorder %s358_s8, %s654_s16  ;;  %p659_p7 = scmp.lt.s32.totalorder %s358_s8, %s922_s2 }
 0x340   : > { %p660_p10 = scmp.lt.s32.totalorder %s658_s20, %s654_s16 }
 0x341   : > { %p656_p0 = pnand %p655_p4, %p801_p9 }
 0x342   : > { %p661_p8 = por %p660_p10, %p659_p7 }
 0x343   : > { %p657_p1 = pneg %p656_p0 }
 0x345   : > { %p662_p13 = pnand %p661_p8, %p657_p1 }
 0x347   : > { %665 = shalt.err (!%p662_p13)
}
 0x348   : > { %507 = dma.vmem_to_hbm [thread:$0]  (%p801_p9), %s361_s29, 128, %s358_s8, %s346_s30  }
 0x349 PF: > { %p521_p2 = scmp.ge.s32.totalorder %s724_s14, 2  ;;  %s372_s18 = sand.u32 1, %s704_s9  }
 0x34a   : > { %s373_s27 = scalar_lea.sflag [#allocation6], %s372_s18 }
 0x34b   : > { %p517_p12 = pnand %p521_p2, %p808_p11 }
 0x34d   : > { %p518_p3 = pneg %p517_p12 }
 0x34f   : > { %699 = dma.done.wait (%p518_p3), %s373_s27, 128  }
 0x350   : > { %701 = vsyncadd (%p518_p3), %s373_s27, 4294967168  ;;  %s21_s14 = sadd.s32 1, %s724_s14   ;;  %s929_s9 = smov %s708_s10 }
 0x351   : > { %p18_p5 = scmp.ge.s32.totalorder %s21_s14, 6   ;;  %s930_s10 = smov %s712_s11 }
 0x352   : > { %s931_s11 = smov %s806_s23  ;;  %s932_s12 = smov %s720_s13 }
 0x353   : > { %s933_s13 = smov %s935_s17  ;;  %20 = sbr.rel (!%p18_p5) target bundleno = 8 (0x8), region = 90 }
 0x358   :  { %378 = vsyncpa [#allocation5], 1 }
 0x359   :  { %380 = vsyncpa [#allocation5 + $0x1], 1 }
 0x35a   :  { %381 = vsyncpa [#allocation8], 1 }
 0x35b   :  { %383 = vsyncpa [#allocation8 + $0x1], 1 }
 0x35c   :  { %384 = vsyncpa [#allocation6], 1 }
 0x35d   :  { %386 = vsyncpa [#allocation6 + $0x1], 1 }

</bundles_post_ra>
